<compile_context>
chip_gen: v7x
topology: tpu7x:2x2x1
jax: 0.10.0
libtpu: 0.0.40
codegen_flags: <defaults>
</compile_context>

<pallas_src>
import functools
import math

import numpy as np
import jax
import jax.numpy as jnp
from jax.experimental import pallas as pl
from jax.experimental.pallas import tpu as pltpu

LN_EPS = 1e-5
WINDOW = 8                       # swin_v2_t window_size = [8, 8]
ACT_DTYPE = jnp.bfloat16         # storage / MXU-input dtype (accumulation stays f32)


def _round_up(v, m):
    return ((v + m - 1) // m) * m


@functools.lru_cache(maxsize=1)
def _vmem_limit():
    """~75% of physical VMEM: 96 MiB on v5e/v6e (128 MiB), 48 MiB on v7x (64 MiB)."""
    cap = 64 * 1024 * 1024
    try:
        cap = int(pltpu.get_tpu_info().vmem_capacity_bytes)
    except Exception:
        pass
    return min(cap * 3 // 4, 100 * 1024 * 1024)


def _pick_tile_m(M, cap_rows):
    """Multiple-of-8 row tile dividing round_up(M, 8) (so no big pad copies), preferring
    >= 2 grid steps (v7x megacore / DMA overlap) and staying close to cap_rows."""
    M8 = _round_up(M, 8)
    cap = max(8, min((cap_rows // 8) * 8, M8))
    t = cap
    while t >= max(8, cap // 2):              # prefer a large divisor with >= 2 steps
        if M8 % t == 0 and M8 // t >= 2:
            return t
        t -= 8
    t = cap                                    # fallback: largest divisor <= cap
    while t >= 8:
        if M8 % t == 0:
            return t
        t -= 8
    return cap


# --------------------------------------------------------------------------------------
# In-kernel helpers
# --------------------------------------------------------------------------------------

def _gelu_tanh(x):
    # tanh-form GELU -> EUP transcendental slot (otherwise idle), frees VALU bundle slots.
    # TODO(synk): torch nn.GELU() default is the exact erf form; tanh approx differs ~1e-3.
    return 0.5 * x * (1.0 + jnp.tanh(0.7978845608028654 * (x + 0.044715 * (x * x * x))))


def _ln(y, g, b):
    mu = jnp.mean(y, axis=-1, keepdims=True)
    yc = y - mu
    var = jnp.mean(yc * yc, axis=-1, keepdims=True)
    return yc * jax.lax.rsqrt(var + LN_EPS) * g + b


# --------------------------------------------------------------------------------------
# Pallas kernels
# --------------------------------------------------------------------------------------

def _linear_kernel(x_ref, w_ref, b_ref, *rest, act, fuse_ln):
    """y = x @ w + b  [-> act] [-> LayerNorm]  for one M tile."""
    o_ref = rest[-1]
    y = jnp.dot(x_ref[...], w_ref[...], preferred_element_type=jnp.float32) + b_ref[...]
    if act == "relu":
        y = jnp.maximum(y, 0.0)
    elif act == "gelu":
        y = _gelu_tanh(y)
    if fuse_ln:
        y = _ln(y, rest[0][...], rest[1][...])
    o_ref[...] = y.astype(o_ref.dtype)


def _mlp_kernel(x_ref, w1_ref, b1_ref, w2_ref, b2_ref, g_ref, beta_ref, o_ref):
    """Fused Swin MLP branch: out = x + LN(W2 @ gelu(W1 @ x + b1) + b2) for one M tile.
    The (tile_m, 4C) hidden lives only in VMEM (never written to HBM)."""
    x = x_ref[...]                                                     # (tm, C) bf16
    h = jnp.dot(x, w1_ref[...], preferred_element_type=jnp.float32) + b1_ref[...]
    h = _gelu_tanh(h)
    y = jnp.dot(h.astype(jnp.bfloat16), w2_ref[...],
                preferred_element_type=jnp.float32) + b2_ref[...]
    y = _ln(y, g_ref[...], beta_ref[...])                              # post-norm (norm2)
    y = y + x.astype(jnp.float32)                                      # residual
    o_ref[...] = y.astype(o_ref.dtype)


def _attn_block_kernel(x_ref, wqkv_ref, bqkv_ref, wproj_ref, bproj_ref,
                       g_ref, beta_ref, bias_ref, scale_ref, *rest,
                       num_heads, has_mask, wb, win):
    """Fused Swin-V2 attention branch for one column-strip of `wb` stacked windows.

    x_ref      : (1, wb*win, win, C)  slice of the padded/rolled NHWC feature map (bf16)
    wqkv/wproj : (C, 3C) / (C, C)  bf16        bqkv/bproj : (1, 3C) / (1, C)  f32
    g/beta     : (1, C) post-norm (norm1)      bias_ref   : (num_heads, L, L) f32
    scale_ref  : (1, num_heads) exp(clamped logit_scale)
    mask       : (wb, 1, L, L) f32 (only for shifted windows)
    out        : (1, wb*win, win, C) = x + LayerNorm(proj(cosine_window_attention(x)))
    """
    o_ref = rest[-1]
    C = x_ref.shape[-1]
    L = win * win
    D = C // num_heads
    rows = wb * L

    # (1, wb*win, win, C) -> (rows, C): leading-dim collapse, lane dim unchanged (cheap).
    x2 = x_ref[...].reshape(rows, C)

    # qkv projection: one lane-dense GEMM for all windows and heads.
    qkv = jnp.dot(x2, wqkv_ref[...], preferred_element_type=jnp.float32) + bqkv_ref[...]
    # Head split with a single relayout: (rows, 3C) -> (wb, 3H, L, D).
    qkv = jnp.transpose(qkv.reshape(wb, L, 3 * num_heads, D), (0, 2, 1, 3))
    q = qkv[:, :num_heads]                              # (wb, H, L, D) f32
    k = qkv[:, num_heads:2 * num_heads]
    v = qkv[:, 2 * num_heads:]

    # Cosine attention: L2-normalize along D; fold exp(logit_scale) into q's inv-norm.
    scale = scale_ref[...].reshape(1, num_heads, 1, 1)
    inv_q = jax.lax.rsqrt(jnp.maximum(jnp.sum(q * q, -1, keepdims=True), 1e-24)) * scale
    inv_k = jax.lax.rsqrt(jnp.maximum(jnp.sum(k * k, -1, keepdims=True), 1e-24))
    qn = (q * inv_q).astype(jnp.bfloat16).reshape(wb * num_heads, L, D)
    kn = (k * inv_k).astype(jnp.bfloat16).reshape(wb * num_heads, L, D)
    vb = v.astype(jnp.bfloat16).reshape(wb * num_heads, L, D)

    attn = jnp.einsum("bld,bmd->blm", qn, kn,
                      preferred_element_type=jnp.float32)          # (wb*H, L, L)
    attn = attn.reshape(wb, num_heads, L, L) + bias_ref[...]
    if has_mask:
        attn = attn + rest[0][...]                                 # (wb, 1, L, L)
    attn = attn - jnp.max(attn, axis=-1, keepdims=True)
    probs = jnp.exp(attn)
    probs = probs * pl.reciprocal(jnp.sum(probs, axis=-1, keepdims=True), approx=True)
    probs = probs.reshape(wb * num_heads, L, L).astype(jnp.bfloat16)

    ctx = jnp.einsum("blm,bmd->bld", probs, vb,
                     preferred_element_type=jnp.float32)           # (wb*H, L, D)
    # Back to token-major (rows, C): second (and last) relayout.
    ctx = jnp.transpose(ctx.reshape(wb, num_heads, L, D), (0, 2, 1, 3)).reshape(rows, C)

    y = jnp.dot(ctx.astype(jnp.bfloat16), wproj_ref[...],
                preferred_element_type=jnp.float32) + bproj_ref[...]
    y = _ln(y, g_ref[...], beta_ref[...])          # post-norm (norm1)
    y = y + x2.astype(jnp.float32)                 # residual (same window coordinates)
    o_ref[...] = y.astype(o_ref.dtype).reshape(o_ref.shape)


def _norm_pool_kernel(x_ref, g_ref, b_ref, o_ref):
    # swin.norm + permute + AdaptiveAvgPool2d(1) + flatten, one batch element per step.
    x = x_ref[...].astype(jnp.float32)                        # (1, T, C)
    y = _ln(x, g_ref[...], b_ref[...])
    o_ref[...] = jnp.mean(y, axis=1, keepdims=True).astype(o_ref.dtype)


# --------------------------------------------------------------------------------------
# Pallas wrappers
# --------------------------------------------------------------------------------------

def linear(x, w_kn, b=None, *, act=None, ln=None, out_dtype=ACT_DTYPE):
    """x: (..., K) @ w_kn: (K, N) (+ b), with optional fused act / LayerNorm."""
    orig = x.shape
    K = orig[-1]
    N = w_kn.shape[1]
    x2 = x.reshape(-1, K).astype(ACT_DTYPE)
    M = x2.shape[0]

    base_cap = 1024 if _vmem_limit() >= 90 * 1024 * 1024 else 512
    row_bytes = 4 * K + 8 * N                      # rough VMEM bytes per activation row
    tile_m = _pick_tile_m(M, min(base_cap, max(8, (12 << 20) // row_bytes)))
    Mp = _round_up(M, tile_m)
    if Mp != M:
        x2 = jnp.pad(x2, ((0, Mp - M), (0, 0)))
    bb = (jnp.zeros((N,), jnp.float32) if b is None else b.astype(jnp.float32)).reshape(1, N)

    args = [x2, w_kn.astype(ACT_DTYPE), bb]
    in_specs = [pl.BlockSpec((tile_m, K), lambda i: (i, 0)),
                pl.BlockSpec((K, N), lambda i: (0, 0)),
                pl.BlockSpec((1, N), lambda i: (0, 0))]
    if ln is not None:
        g, beta = ln
        args += [g.reshape(1, N).astype(jnp.float32), beta.reshape(1, N).astype(jnp.float32)]
        in_specs += [pl.BlockSpec((1, N), lambda i: (0, 0)),
                     pl.BlockSpec((1, N), lambda i: (0, 0))]

    out = pl.pallas_call(
        functools.partial(_linear_kernel, act=act, fuse_ln=ln is not None),
        out_shape=jax.ShapeDtypeStruct((Mp, N), out_dtype),
        grid=(Mp // tile_m,),
        in_specs=in_specs,
        out_specs=pl.BlockSpec((tile_m, N), lambda i: (i, 0)),
        compiler_params=pltpu.CompilerParams(
            dimension_semantics=("parallel",),
            vmem_limit_bytes=_vmem_limit()),
    )(*args)
    return out[:M].reshape(orig[:-1] + (N,))


def mlp_branch(x, p):
    """x + LayerNorm(W2 @ gelu(W1 @ x + b1) + b2) -- whole MLP branch in one pallas_call."""
    B, H, W, C = x.shape
    Ch = p["mlp_w1"].shape[1]
    M = B * H * W
    x2 = x.reshape(M, C).astype(ACT_DTYPE)

    base_cap = 1024 if _vmem_limit() >= 90 * 1024 * 1024 else 512
    row_bytes = 12 * C + 6 * Ch                    # x/out/residual + f32+bf16 hidden
    tile_m = _pick_tile_m(M, min(base_cap, max(8, (12 << 20) // row_bytes)))
    Mp = _round_up(M, tile_m)
    if Mp != M:
        x2 = jnp.pad(x2, ((0, Mp - M), (0, 0)))

    out = pl.pallas_call(
        _mlp_kernel,
        out_shape=jax.ShapeDtypeStruct((Mp, C), ACT_DTYPE),
        grid=(Mp // tile_m,),
        in_specs=[pl.BlockSpec((tile_m, C), lambda i: (i, 0)),
                  pl.BlockSpec((C, Ch), lambda i: (0, 0)),
                  pl.BlockSpec((1, Ch), lambda i: (0, 0)),
                  pl.BlockSpec((Ch, C), lambda i: (0, 0)),
                  pl.BlockSpec((1, C), lambda i: (0, 0)),
                  pl.BlockSpec((1, C), lambda i: (0, 0)),
                  pl.BlockSpec((1, C), lambda i: (0, 0))],
        out_specs=pl.BlockSpec((tile_m, C), lambda i: (i, 0)),
        compiler_params=pltpu.CompilerParams(
            dimension_semantics=("parallel",),
            vmem_limit_bytes=_vmem_limit()),
    )(x2,
      p["mlp_w1"].astype(ACT_DTYPE), p["mlp_b1"].reshape(1, Ch).astype(jnp.float32),
      p["mlp_w2"].astype(ACT_DTYPE), p["mlp_b2"].reshape(1, C).astype(jnp.float32),
      p["norm2_g"].reshape(1, C).astype(jnp.float32),
      p["norm2_b"].reshape(1, C).astype(jnp.float32))
    return out[:M].reshape(B, H, W, C)


def norm_mean_pool(x_btc, g, b):
    """(B, T, C) -> LayerNorm(C) -> mean over tokens -> (B, C)  (f32)."""
    B, T, C = x_btc.shape
    out = pl.pallas_call(
        _norm_pool_kernel,
        out_shape=jax.ShapeDtypeStruct((B, 1, C), jnp.float32),
        grid=(B,),
        in_specs=[pl.BlockSpec((1, T, C), lambda i: (i, 0, 0)),
                  pl.BlockSpec((1, C), lambda i: (0, 0)),
                  pl.BlockSpec((1, C), lambda i: (0, 0))],
        out_specs=pl.BlockSpec((1, 1, C), lambda i: (i, 0, 0)),
        compiler_params=pltpu.CompilerParams(
            dimension_semantics=("parallel",),
            vmem_limit_bytes=_vmem_limit()),
    )(x_btc, g.reshape(1, C).astype(jnp.float32), b.reshape(1, C).astype(jnp.float32))
    return out[:, 0, :]


# --------------------------------------------------------------------------------------
# Swin-V2 building blocks (layout glue in XLA, compute in Pallas)
# --------------------------------------------------------------------------------------

@functools.lru_cache(maxsize=None)
def _attn_mask_np(pH, pW, ws, sh, sw):
    """torchvision shifted-window attention mask (static per stage), (nW, L, L)."""
    m = np.zeros((pH, pW), np.float32)
    h_slices = ((0, pH - ws), (pH - ws, pH - sh), (pH - sh, pH))
    w_slices = ((0, pW - ws), (pW - ws, pW - sw), (pW - sw, pW))
    cnt = 0
    for h0, h1 in h_slices:
        for w0, w1 in w_slices:
            m[h0:h1, w0:w1] = cnt
            cnt += 1
    m = m.reshape(pH // ws, ws, pW // ws, ws).transpose(0, 2, 1, 3).reshape(-1, ws * ws)
    diff = m[:, None, :] - m[:, :, None]
    return np.where(diff != 0, -100.0, 0.0).astype(np.float32)


def _pick_wbh(nWh, L, C, num_heads):
    """Vertically-stacked windows per grid step: keep the per-step GEMM rows near 256-512
    while the rough per-step VMEM footprint stays small."""
    best = 1
    for d in range(1, nWh + 1):
        if nWh % d:
            continue
        rows = d * L
        if rows > 512:
            break
        foot = (rows * 3 * C * 4                       # qkv f32
                + 2 * d * num_heads * L * L * 4        # attn logits + probs f32
                + 4 * rows * C * 2                     # x/out tiles bf16, double-buffered
                + 3 * rows * C * 4)                    # split-head q/k/v copies f32
        if foot <= 12 * 1024 * 1024:
            best = d
    return best


def attention_branch(x, p, shift, norm_g, norm_b):
    """x + LayerNorm(shifted_window_attention(x)); window partition/reverse is expressed
    through the BlockSpec (no extra feature-map passes in XLA)."""
    B, H, W, C = x.shape
    ws = WINDOW
    num_heads = p["logit_scale"].shape[0]
    L = ws * ws

    pad_b = (-H) % ws
    pad_r = (-W) % ws
    xp = jnp.pad(x, ((0, 0), (0, pad_b), (0, pad_r), (0, 0))) if (pad_b or pad_r) else x
    pH, pW = H + pad_b, W + pad_r
    sh = shift if ws < pH else 0
    sw = shift if ws < pW else 0
    if sh or sw:
        # TODO(synk): the cyclic shift (wraparound) cannot be expressed by a BlockSpec
        # index_map; it stays as a cheap jnp.roll in XLA.
        xp = jnp.roll(xp, shift=(-sh, -sw), axis=(1, 2))
    xp = xp.astype(ACT_DTYPE)

    nWh, nWw = pH // ws, pW // ws
    shifted = bool(sh or sw)
    wbh = _pick_wbh(nWh, L, C, num_heads)

    scale = jnp.exp(jnp.minimum(p["logit_scale"], math.log(100.0)))
    scale = scale.astype(jnp.float32).reshape(1, num_heads)

    args = [xp,
            p["qkv_w"].astype(ACT_DTYPE), p["qkv_b"].reshape(1, 3 * C).astype(jnp.float32),
            p["proj_w"].astype(ACT_DTYPE), p["proj_b"].reshape(1, C).astype(jnp.float32),
            norm_g.reshape(1, C).astype(jnp.float32), norm_b.reshape(1, C).astype(jnp.float32),
            p["rel_bias"].astype(jnp.float32), scale]
    in_specs = [
        pl.BlockSpec((1, wbh * ws, ws, C), lambda b, i, j: (b, i, j, 0)),
        pl.BlockSpec((C, 3 * C), lambda b, i, j: (0, 0)),
        pl.BlockSpec((1, 3 * C), lambda b, i, j: (0, 0)),
        pl.BlockSpec((C, C), lambda b, i, j: (0, 0)),
        pl.BlockSpec((1, C), lambda b, i, j: (0, 0)),
        pl.BlockSpec((1, C), lambda b, i, j: (0, 0)),
        pl.BlockSpec((1, C), lambda b, i, j: (0, 0)),
        pl.BlockSpec((num_heads, L, L), lambda b, i, j: (0, 0, 0)),
        pl.BlockSpec((1, num_heads), lambda b, i, j: (0, 0)),
    ]
    if shifted:
        mask = jnp.asarray(_attn_mask_np(pH, pW, ws, sh, sw)).reshape(nWh, nWw, L, L)
        args.append(mask)
        in_specs.append(pl.BlockSpec((wbh, 1, L, L), lambda b, i, j: (i, j, 0, 0)))

    out = pl.pallas_call(
        functools.partial(_attn_block_kernel, num_heads=num_heads,
                          has_mask=shifted, wb=wbh, win=ws),
        out_shape=jax.ShapeDtypeStruct((B, pH, pW, C), ACT_DTYPE),
        grid=(B, nWh // wbh, nWw),
        in_specs=in_specs,
        out_specs=pl.BlockSpec((1, wbh * ws, ws, C), lambda b, i, j: (b, i, j, 0)),
        compiler_params=pltpu.CompilerParams(
            dimension_semantics=("parallel", "parallel", "parallel"),
            vmem_limit_bytes=_vmem_limit()),
    )(*args)

    if sh or sw:
        out = jnp.roll(out, shift=(sh, sw), axis=(1, 2))
    return out[:, :H, :W, :] if (pad_b or pad_r) else out


def swin_block(x, p, shift):
    # SwinTransformerBlockV2 (post-norm): x = x + norm1(attn(x)); x = x + norm2(mlp(x))
    x = attention_branch(x, p["attn"], shift, p["norm1_g"], p["norm1_b"])
    x = mlp_branch(x, p)
    return x


def patch_merging(x, p):
    # PatchMergingV2: concat 2x2 neighbours -> Linear(4C, 2C, bias=False) -> LayerNorm(2C)
    B, H, W, C = x.shape
    if H % 2 or W % 2:
        x = jnp.pad(x, ((0, 0), (0, H % 2), (0, W % 2), (0, 0)))
    x0 = x[:, 0::2, 0::2, :]
    x1 = x[:, 1::2, 0::2, :]
    x2 = x[:, 0::2, 1::2, :]
    x3 = x[:, 1::2, 1::2, :]
    xc = jnp.concatenate([x0, x1, x2, x3], axis=-1)
    return linear(xc, p["red_w"], None, ln=(p["norm_g"], p["norm_b"]))


def patch_embed(x_nchw, p):
    # Conv2d(3, 96, k=4, s=4) == non-overlapping 4x4 patch extraction + matmul, then LN
    B, Cin, H, W = x_nchw.shape
    Hp, Wp = H // 4, W // 4
    x = x_nchw.reshape(B, Cin, Hp, 4, Wp, 4).transpose(0, 2, 4, 1, 3, 5)
    x = x.reshape(B, Hp, Wp, Cin * 16)                           # (c, kh, kw) flatten order
    return linear(x, p["w"], p["b"], ln=(p["ln_g"], p["ln_b"]))  # (B, Hp, Wp, 96) NHWC


def swin_v2_t_forward(x_nchw, params):
    x = patch_embed(x_nchw, params["patch_embed"])
    for stage in params["stages"]:
        for bi, blk in enumerate(stage["blocks"]):
            shift = 0 if bi % 2 == 0 else WINDOW // 2
            x = swin_block(x, blk, shift)
        if stage["merge"] is not None:
            x = patch_merging(x, stage["merge"])
    B, H, W, C = x.shape
    return norm_mean_pool(x.reshape(B, H * W, C), params["norm_g"], params["norm_b"])


# --------------------------------------------------------------------------------------
# Relative position bias (Swin V2 continuous bias) and synthetic parameters
# --------------------------------------------------------------------------------------

def compute_rel_bias(cpb_w1, cpb_b1, cpb_w2, num_heads, ws=WINDOW):
    """16 * sigmoid(MLP(log-spaced relative coords))  -> (num_heads, L, L) f32."""
    r = np.arange(-(ws - 1), ws, dtype=np.float32)
    table = np.stack(np.meshgrid(r, r, indexing="ij"), axis=-1)      # (2w-1, 2w-1, 2)
    table = table / (ws - 1) * 8.0
    table = np.sign(table) * np.log2(np.abs(table) + 1.0) / 3.0
    table = jnp.asarray(table.reshape(-1, 2))                        # (225, 2)
    h = linear(table, cpb_w1, cpb_b1, act="relu")                    # (225, 512)
    out = linear(h, cpb_w2, None, out_dtype=jnp.float32)             # (225, num_heads)

    coords = np.stack(np.meshgrid(np.arange(ws), np.arange(ws), indexing="ij"))
    cf = coords.reshape(2, -1)
    rel = (cf[:, :, None] - cf[:, None, :]).transpose(1, 2, 0)
    rel[..., 0] += ws - 1
    rel[..., 1] += ws - 1
    rel[..., 0] *= 2 * ws - 1
    idx = rel.sum(-1).reshape(-1)                                    # (L*L,)
    bias = out[idx].reshape(ws * ws, ws * ws, num_heads)
    bias = jnp.transpose(bias, (2, 0, 1))                            # (H, L, L)
    return (16.0 * jax.nn.sigmoid(bias)).astype(jnp.float32)


def init_params(key):
    embed_dim = 96
    depths = (2, 2, 6, 2)
    heads = (3, 6, 12, 24)
    keys = iter(jax.random.split(key, 256))

    def wmat(k_in, n_out, std=0.02):
        # torch Linear weight is (N, K); store transposed (K, N) in bf16 for the MXU.
        w = std * jax.random.normal(next(keys), (n_out, k_in), dtype=jnp.float32)
        return w.T.astype(jnp.bfloat16)

    def zeros(n):
        return jnp.zeros((n,), jnp.float32)

    def ones(n):
        return jnp.ones((n,), jnp.float32)

    conv_w = 0.02 * jax.random.normal(next(keys), (embed_dim, 3, 4, 4), jnp.float32)
    params = {
        "patch_embed": dict(
            w=conv_w.reshape(embed_dim, -1).T.astype(jnp.bfloat16),   # (48, 96)
            b=zeros(embed_dim), ln_g=ones(embed_dim), ln_b=zeros(embed_dim)),
    }
    stages = []
    for si, (depth, nh) in enumerate(zip(depths, heads)):
        dim = embed_dim * (2 ** si)
        blocks = []
        for _ in range(depth):
            # NOTE: Swin-V2 zeroes the k-bias chunk (qkv_bias[dim:2*dim]) every forward;
            # synthetic biases are all-zero, but real checkpoints must be zeroed at load.
            qkv_b = zeros(3 * dim)
            cpb_w1, cpb_b1, cpb_w2 = wmat(2, 512), zeros(512), wmat(512, nh)
            attn = dict(
                qkv_w=wmat(dim, 3 * dim), qkv_b=qkv_b,
                proj_w=wmat(dim, dim), proj_b=zeros(dim),
                logit_scale=jnp.full((nh,), math.log(10.0), jnp.float32),
                rel_bias=compute_rel_bias(cpb_w1, cpb_b1, cpb_w2, nh),
            )
            blocks.append(dict(
                attn=attn,
                norm1_g=ones(dim), norm1_b=zeros(dim),
                mlp_w1=wmat(dim, 4 * dim), mlp_b1=zeros(4 * dim),
                mlp_w2=wmat(4 * dim, dim), mlp_b2=zeros(dim),
                norm2_g=ones(dim), norm2_b=zeros(dim)))
        merge = None
        if si < 3:
            merge = dict(red_w=wmat(4 * dim, 2 * dim),
                         norm_g=ones(2 * dim), norm_b=zeros(2 * dim))
        stages.append(dict(blocks=blocks, merge=merge))
    params["stages"] = stages
    params["norm_g"] = ones(embed_dim * 8)
    params["norm_b"] = zeros(embed_dim * 8)
    return params


# --------------------------------------------------------------------------------------

if __name__ == "__main__":
    key = jax.random.PRNGKey(0)
    pkey, xkey = jax.random.split(key)
    params = init_params(pkey)

    # small input consistent with the module: NCHW, 3 channels, spatial 64
    x = jax.random.normal(xkey, (2, 3, 64, 64), jnp.float32)

    fwd = jax.jit(swin_v2_t_forward)
    out = jax.block_until_ready(fwd(x, params))
    assert out.shape == (2, 768), out.shape
    assert bool(jnp.all(jnp.isfinite(out)))
    print("KERNEL_OK")
</pallas_src>

<mosaic_0001>
module attributes {stable_mosaic.version = 11 : i64} {
  func.func @_linear_kernel(%arg0: i32, %arg1: memref<232x2xbf16, #tpu.memory_space<vmem>>, %arg2: memref<2x512xbf16, #tpu.memory_space<vmem>>, %arg3: memref<1x512xf32, #tpu.memory_space<vmem>>, %arg4: memref<232x512xbf16, #tpu.memory_space<vmem>>) attributes {dimension_semantics = [#tpu.dimension_semantics<parallel>], iteration_bounds = array<i64: 1>, scalar_prefetch = 0 : i64, scratch_operands = 0 : i64, tpu.core_type = #tpu.core_type<tc>, window_params = [{transform_indices = @transform_0, window_bounds = array<i64: 232, 2>}, {pipeline_mode = #tpu.pipeline_mode<synchronous>, transform_indices = @transform_1, window_bounds = array<i64: 2, 512>}, {pipeline_mode = #tpu.pipeline_mode<synchronous>, transform_indices = @transform_2, window_bounds = array<i64: 1, 512>}, {transform_indices = @transform_3, window_bounds = array<i64: 232, 512>}]} {
    %c0 = arith.constant 0 : index
    %c0_0 = arith.constant 0 : index
    %0 = vector.load %arg1[%c0, %c0_0] : memref<232x2xbf16, #tpu.memory_space<vmem>>, vector<232x2xbf16>
    %c0_1 = arith.constant 0 : index
    %c0_2 = arith.constant 0 : index
    %1 = vector.load %arg2[%c0_1, %c0_2] : memref<2x512xbf16, #tpu.memory_space<vmem>>, vector<2x512xbf16>
    %cst = arith.constant dense<0.000000e+00> : vector<232x512xf32>
    %2 = tpu.matmul %0, %1, %cst {dimension_numbers = #tpu.dot_dimension_numbers<[1], [0], [0], [1], [0, 0, 1, 1], [], []>} : vector<232x2xbf16>, vector<2x512xbf16>, vector<232x512xf32> -> vector<232x512xf32>
    %c0_3 = arith.constant 0 : index
    %c0_4 = arith.constant 0 : index
    %3 = vector.load %arg3[%c0_3, %c0_4] : memref<1x512xf32, #tpu.memory_space<vmem>>, vector<1x512xf32>
    %4 = vector.broadcast %3 : vector<1x512xf32> to vector<232x512xf32>
    %5 = arith.addf %2, %4 : vector<232x512xf32>
    %cst_5 = arith.constant 0.000000e+00 : f32
    %6 = vector.broadcast %cst_5 : f32 to vector<232x512xf32>
    %7 = arith.maximumf %5, %6 : vector<232x512xf32>
    %8 = arith.truncf %7 : vector<232x512xf32> to vector<232x512xbf16>
    %c0_6 = arith.constant 0 : index
    %c0_7 = arith.constant 0 : index
    %9 = vector.load %arg4[%c0_6, %c0_7] : memref<232x512xbf16, #tpu.memory_space<vmem>>, vector<232x512xbf16>
    tpu.vector_store %arg4[%c0_6, %c0_7], %8 {strides = array<i32>} : memref<232x512xbf16, #tpu.memory_space<vmem>>, vector<232x512xbf16>,
    return
  }
  func.func @transform_0(%arg0: i32) -> (i32, i32) {
    %c0_i32 = arith.constant 0 : i32
    %c0_i32_0 = arith.constant 0 : i32
    return %arg0, %c0_i32 : i32, i32
  }
  func.func @transform_1(%arg0: i32) -> (i32, i32) {
    %c0_i32 = arith.constant 0 : i32
    %c0_i32_0 = arith.constant 0 : i32
    %c0_i32_1 = arith.constant 0 : i32
    return %c0_i32, %c0_i32_0 : i32, i32
  }
  func.func @transform_2(%arg0: i32) -> (i32, i32) {
    %c0_i32 = arith.constant 0 : i32
    %c0_i32_0 = arith.constant 0 : i32
    %c0_i32_1 = arith.constant 0 : i32
    return %c0_i32, %c0_i32_0 : i32, i32
  }
  func.func @transform_3(%arg0: i32) -> (i32, i32) {
    %c0_i32 = arith.constant 0 : i32
    %c0_i32_0 = arith.constant 0 : i32
    return %arg0, %c0_i32 : i32, i32
  }
}

</mosaic_0001>

<bundles_post_ra>
// kernel: tpu_custom_call.1
= control target key start
LH: loop header
LB: loop body
LE: loop exit
PB: predicated region body
PF: predicated region fallthrough
CT: control target
= control target key end

     0   :  { %v48_v1 = vlaneseq  ;;  %v1337_v3 = vmov 1966171168   ;;  %v1338_v5 = vmov 0   ;;  %vm212_vm0 = vcmask 1040384   ;;  %s1616_s0 = inlined_call_operand.vmem [shape: bf16[232,2], index: 0, kind: input, shape index: {}]   ;;  %s1617_s1 = inlined_call_operand.vmem [shape: bf16[2,512], index: 1, kind: input, shape index: {}]   ;;  %s1618_s2 = inlined_call_operand.vmem [shape: f32[1,512], index: 2, kind: input, shape index: {}]   ;;  %s1619_s3 = inlined_call_operand.hbm [shape: bf16[232,512], index: 3, kind: output, shape index: {}]  }
   0x1   :  { %v1144_v0 = vld.sshfl [vmem:[%s1617_s1] sm:$0x33 pattern:$0x75316420]  ;;  %v151_v4 = vunpack.c.l.s4 %v1337_v3  ;;  %257 = vmatprep.mubr.bf16.mxu0 %v1338_v5  ;;  %438 = vmatprep.mubr.bf16.mxu1 %v1338_v5  ;;  %vm166_vm1 = vcmask 15360  }
   0x2   :  { %v1365_v2 = vshrl.u32 %v48_v1, 7  ;;  %v149_v6 = vcombine.high %v1144_v0, %v1144_v0  ;;  %v1298_v14 = vld [vmem:[%s1616_s0] sm:$0xff]  }
   0x3   :  { %v152_v7 = vunpack.c.0.s8 %v151_v4 }
   0x5   :  { %v155_v8 = vsub.s32 %v152_v7, %v1365_v2 }
   0x7   :  { %v163_v9 = vrot.slane %v149_v6, %v155_v8  ;;  %v156_v10 = vrot.slane %v1144_v0, %v155_v8 }
   0x9   :  { %1145 = vmatprep.subr.msk.bf16.mxu0 %vm212_vm0, %v163_v9  ;;  %v214_v11 = vsel %vm212_vm0, %v156_v10, 0  ;;  %v165_v12 = vcombine.high %v163_v9, %v163_v9  ;;  %v164_v13 = vcombine.high %v156_v10, %v156_v10 }
   0xa   :  { %226 = vmatpush1.bf16.msra.mxu0 %v214_v11 }
   0xb   :  { %1161 = vmatprep.subr.msk.bf16.mxu1 %vm212_vm0, %v165_v12  ;;  %v220_v15 = vsel %vm212_vm0, %v164_v13, 0 }
   0xc   :  { %407 = vmatpush1.bf16.msra.mxu1 %v220_v15 }
   0xd   :  { %1146 = vmatmul.mubr.msk.bf16.vlgmr.msra.gmra.mrb[0].mxu0 %vm166_vm1, %v1298_v14 }
   0xe   :  { %267 = vmatprep.mubr.bf16.mxu0 %v1338_v5 }
   0xf   :  { %1162 = vmatmul.mubr.msk.bf16.vlgmr.msra.gmra.mrb[0].mxu1 %vm166_vm1, %v1298_v14 }
  0x10   :  { %8 = vsyncpa [#allocation3], 0  ;;  %448 = vmatprep.mubr.bf16.mxu1 %v1338_v5  ;;  %v1299_v16 = vld [vmem:[%s1616_s0 + $0x8] sm:$0xff]   ;;  %v1300_v17 = vld [vmem:[%s1616_s0 + $0x10] sm:$0xff]   ;;  %v50_v30 = vsub.s32 0, %v1365_v2  ;;  %v54_v32 = vsub.s32 1, %v1365_v2 }
  0x11   :  { %v1301_v18 = vld [vmem:[%s1616_s0 + $0x18] sm:$0xff]   ;;  %v1302_v19 = vld [vmem:[%s1616_s0 + $0x20] sm:$0xff]   ;;  %v1303_v20 = vld [vmem:[%s1616_s0 + $0x28] sm:$0xff]   ;;  %v58_v33 = vsub.s32 2, %v1365_v2  ;;  %v62_v34 = vsub.s32 3, %v1365_v2 }
  0x12   :  { %v1304_v21 = vld [vmem:[%s1616_s0 + $0x30] sm:$0xff]   ;;  %v1305_v22 = vld [vmem:[%s1616_s0 + $0x38] sm:$0xff]   ;;  %v1306_v23 = vld [vmem:[%s1616_s0 + $0x40] sm:$0xff]  }
  0x13   :  { %v1307_v24 = vld [vmem:[%s1616_s0 + $0x48] sm:$0xff]   ;;  %v1308_v25 = vld [vmem:[%s1616_s0 + $0x50] sm:$0xff]   ;;  %v1309_v26 = vld [vmem:[%s1616_s0 + $0x58] sm:$0xff]  }
  0x14   :  { %v1310_v27 = vld [vmem:[%s1616_s0 + $0x60] sm:$0xff]   ;;  %v1311_v28 = vld [vmem:[%s1616_s0 + $0x68] sm:$0xff]   ;;  %v1312_v29 = vld [vmem:[%s1616_s0 + $0x70] ss:$0 sps:$4 sm:$0xff]   ;;  %s1339_s0 = smov [#allocation2]  }
  0x15   :  { %1147 = vmatmul.mubr.msk.bf16.gmra.mrb[4].mxu0 %vm166_vm1, %v1299_v16  ;;  %v46_v31 = vld [vmem:[%s1618_s2] sm:$0xf]  ;;  %s1118_s2 = sshll.u32 %s1339_s0, 4  ;;  %s1119_s2 = int_to_ptr.vmem [resolvable:$true] %s1118_s2 }
  0x16   :  { %277 = vmatprep.mubr.bf16.mxu0 %v1338_v5  ;;  %v1480_v35 = vrot.slane %v46_v31, %v50_v30  ;;  %v1482_v36 = vrot.slane %v46_v31, %v54_v32  ;;  %v1484_v37 = vrot.slane %v46_v31, %v58_v33  ;;  %v1486_v38 = vrot.slane %v46_v31, %v62_v34  ;;  %s1313_s17 = scalar_lea.vmem %s1119_s2, 7424  ;;  %p1318_p1 = scmp.lt.s32.totalorder %s1119_s2, %s1119_s2 }
  0x17   :  { %1163 = vmatmul.mubr.msk.bf16.gmra.mrb[4].mxu1 %vm166_vm1, %v1299_v16  ;;  %p1314_p0 = scmp.ne.s32.totalorder %s1119_s2, %s1313_s17  ;;  %p1319_p2 = scmp.lt.s32.totalorder %s1313_s17, %s1313_s17 }
  0x18   :  { %458 = vmatprep.mubr.bf16.mxu1 %v1338_v5 }
  0x19   :  { %p1320_p3 = por %p1319_p2, %p1318_p1 }
  0x1b   :  { %p1321_p4 = pnand %p1320_p3, %p1314_p0 }
  0x1d   :  { %1148 = vmatmul.mubr.msk.bf16.gmra.mrb[8].mxu0 %vm166_vm1, %v1300_v17 }
  0x1e   :  { %287 = vmatprep.mubr.bf16.mxu0 %v1338_v5 }
  0x1f   :  { %1164 = vmatmul.mubr.msk.bf16.gmra.mrb[8].mxu1 %vm166_vm1, %v1300_v17 }
  0x20   :  { %468 = vmatprep.mubr.bf16.mxu1 %v1338_v5 }
  0x25   :  { %1149 = vmatmul.mubr.msk.bf16.gmra.mrb[12].mxu0 %vm166_vm1, %v1301_v18 }
  0x26   :  { %297 = vmatprep.mubr.bf16.mxu0 %v1338_v5 }
  0x27   :  { %1165 = vmatmul.mubr.msk.bf16.gmra.mrb[12].mxu1 %vm166_vm1, %v1301_v18 }
  0x28   :  { %478 = vmatprep.mubr.bf16.mxu1 %v1338_v5 }
  0x2d   :  { %1150 = vmatmul.mubr.msk.bf16.gmra.mrb[16].mxu0 %vm166_vm1, %v1302_v19 }
  0x2e   :  { %307 = vmatprep.mubr.bf16.mxu0 %v1338_v5 }
  0x2f   :  { %1166 = vmatmul.mubr.msk.bf16.gmra.mrb[16].mxu1 %vm166_vm1, %v1302_v19 }
  0x30   :  { %488 = vmatprep.mubr.bf16.mxu1 %v1338_v5 }
  0x35   :  { %1151 = vmatmul.mubr.msk.bf16.gmra.mrb[20].mxu0 %vm166_vm1, %v1303_v20 }
  0x36   :  { %317 = vmatprep.mubr.bf16.mxu0 %v1338_v5 }
  0x37   :  { %1167 = vmatmul.mubr.msk.bf16.gmra.mrb[20].mxu1 %vm166_vm1, %v1303_v20 }
  0x38   :  { %498 = vmatprep.mubr.bf16.mxu1 %v1338_v5 }
  0x3d   :  { %1152 = vmatmul.mubr.msk.bf16.gmra.mrb[24].mxu0 %vm166_vm1, %v1304_v21 }
  0x3e   :  { %327 = vmatprep.mubr.bf16.mxu0 %v1338_v5 }
  0x3f   :  { %1168 = vmatmul.mubr.msk.bf16.gmra.mrb[24].mxu1 %vm166_vm1, %v1304_v21 }
  0x40   :  { %508 = vmatprep.mubr.bf16.mxu1 %v1338_v5 }
  0x45   :  { %1153 = vmatmul.mubr.msk.bf16.gmra.mrb[28].mxu0 %vm166_vm1, %v1305_v22 }
  0x46   :  { %337 = vmatprep.mubr.bf16.mxu0 %v1338_v5 }
  0x47   :  { %1169 = vmatmul.mubr.msk.bf16.gmra.mrb[28].mxu1 %vm166_vm1, %v1305_v22 }
  0x48   :  { %518 = vmatprep.mubr.bf16.mxu1 %v1338_v5 }
  0x4d   :  { %1154 = vmatmul.mubr.msk.bf16.gmra.mrb[32].mxu0 %vm166_vm1, %v1306_v23 }
  0x4e   :  { %347 = vmatprep.mubr.bf16.mxu0 %v1338_v5 }
  0x4f   :  { %1170 = vmatmul.mubr.msk.bf16.gmra.mrb[32].mxu1 %vm166_vm1, %v1306_v23 }
  0x50   :  { %528 = vmatprep.mubr.bf16.mxu1 %v1338_v5 }
  0x55   :  { %1155 = vmatmul.mubr.msk.bf16.gmra.mrb[36].mxu0 %vm166_vm1, %v1307_v24 }
  0x56   :  { %357 = vmatprep.mubr.bf16.mxu0 %v1338_v5 }
  0x57   :  { %1171 = vmatmul.mubr.msk.bf16.gmra.mrb[36].mxu1 %vm166_vm1, %v1307_v24 }
  0x58   :  { %538 = vmatprep.mubr.bf16.mxu1 %v1338_v5 }
  0x5d   :  { %1156 = vmatmul.mubr.msk.bf16.gmra.mrb[40].mxu0 %vm166_vm1, %v1308_v25 }
  0x5e   :  { %367 = vmatprep.mubr.bf16.mxu0 %v1338_v5 }
  0x5f   :  { %1172 = vmatmul.mubr.msk.bf16.gmra.mrb[40].mxu1 %vm166_vm1, %v1308_v25 }
  0x60   :  { %548 = vmatprep.mubr.bf16.mxu1 %v1338_v5 }
  0x65   :  { %1157 = vmatmul.mubr.msk.bf16.gmra.mrb[44].mxu0 %vm166_vm1, %v1309_v26 }
  0x66   :  { %377 = vmatprep.mubr.bf16.mxu0 %v1338_v5 }
  0x67   :  { %1173 = vmatmul.mubr.msk.bf16.gmra.mrb[44].mxu1 %vm166_vm1, %v1309_v26 }
  0x68   :  { %558 = vmatprep.mubr.bf16.mxu1 %v1338_v5 }
  0x6d   :  { %1158 = vmatmul.mubr.msk.bf16.gmra.mrb[48].mxu0 %vm166_vm1, %v1310_v27 }
  0x6e   :  { %387 = vmatprep.mubr.bf16.mxu0 %v1338_v5 }
  0x6f   :  { %1174 = vmatmul.mubr.msk.bf16.gmra.mrb[48].mxu1 %vm166_vm1, %v1310_v27 }
  0x70   :  { %568 = vmatprep.mubr.bf16.mxu1 %v1338_v5 }
  0x75   :  { %1159 = vmatmul.mubr.msk.bf16.gmra.mrb[52].mxu0 %vm166_vm1, %v1311_v28 }
  0x76   :  { %397 = vmatprep.mubr.bf16.mxu0 %v1338_v5 }
  0x77   :  { %1175 = vmatmul.mubr.msk.bf16.gmra.mrb[52].mxu1 %vm166_vm1, %v1311_v28 }
  0x78   :  { %578 = vmatprep.mubr.bf16.mxu1 %v1338_v5 }
  0x7d   :  { %1160 = vmatmul.mubr.msk.bf16.gmra.mrb[56].mxu0 %vm166_vm1, %v1312_v29 }
  0x7f   :  { %1176 = vmatmul.mubr.msk.bf16.gmra.mrb[56].mxu1 %vm166_vm1, %v1312_v29 }
  0xe0   :  { %v259_v39 = vpop.f32.mrb[0].mxu0 }
  0xe1   :  { %v260_v40 = vadd.f32 %v259_v39, %v1480_v35  ;;  %v261_v41 = vpop.f32.mrb[1].mxu0 }
  0xe2   :  { %v262_v42 = vadd.f32 %v261_v41, %v1482_v36  ;;  %v263_v43 = vpop.f32.mrb[2].mxu0  ;;  %v440_v44 = vpop.f32.mrb[0].mxu1 }
  0xe3   :  { %v587_v45 = vmax.f32 %v260_v40, 0.0  ;;  %v264_v46 = vadd.f32 %v263_v43, %v1480_v35  ;;  %v441_v47 = vadd.f32 %v440_v44, %v1484_v37  ;;  %v265_v48 = vpop.f32.mrb[3].mxu0  ;;  %v442_v49 = vpop.f32.mrb[1].mxu1 }
  0xe4   :  { %v588_v50 = vmax.f32 %v262_v42, 0.0  ;;  %v266_v51 = vadd.f32 %v265_v48, %v1482_v36  ;;  %v443_v52 = vadd.f32 %v442_v49, %v1486_v38  ;;  %v444_v53 = vpop.f32.mrb[2].mxu1 }
  0xe5   :  { %v591_v54 = vmax.f32 %v264_v46, 0.0  ;;  %v589_v55 = vmax.f32 %v441_v47, 0.0  ;;  %v445_v56 = vadd.f32 %v444_v53, %v1484_v37  ;;  %v446_v57 = vpop.f32.mrb[3].mxu1 }
  0xe6   :  { %v1235_v58 = vpack.c.bf16 %v588_v50, %v587_v45  ;;  %v592_v59 = vmax.f32 %v266_v51, 0.0  ;;  %v590_v60 = vmax.f32 %v443_v52, 0.0  ;;  %v447_v61 = vadd.f32 %v446_v57, %v1486_v38 }
  0xe7   :  { %v593_v62 = vmax.f32 %v445_v56, 0.0 }
  0xe8   :  { %1055 = vst [vmem:[#allocation2] sm:$0xff] %v1235_v58  ;;  %v1237_v63 = vpack.c.bf16 %v592_v59, %v591_v54  ;;  %v1236_v0 = vpack.c.bf16 %v590_v60, %v589_v55  ;;  %v594_v1 = vmax.f32 %v447_v61, 0.0  ;;  %v269_v2 = vpop.f32.mrb[4].mxu0 }
  0xe9   :  { %v270_v3 = vadd.f32 %v269_v2, %v1480_v35  ;;  %v271_v4 = vpop.f32.mrb[5].mxu0 }
  0xea   :  { %1057 = vst [vmem:[#allocation2 + $0x10] sm:$0xff] %v1237_v63  ;;  %1056 = vst [vmem:[#allocation2 + $0x8] sm:$0xff] %v1236_v0  ;;  %v1238_v5 = vpack.c.bf16 %v594_v1, %v593_v62  ;;  %v272_v6 = vadd.f32 %v271_v4, %v1482_v36  ;;  %v273_v7 = vpop.f32.mrb[6].mxu0  ;;  %v450_v8 = vpop.f32.mrb[4].mxu1 }
  0xeb   :  { %v595_v9 = vmax.f32 %v270_v3, 0.0  ;;  %v274_v10 = vadd.f32 %v273_v7, %v1480_v35  ;;  %v451_v11 = vadd.f32 %v450_v8, %v1484_v37  ;;  %v275_v12 = vpop.f32.mrb[7].mxu0  ;;  %v452_v13 = vpop.f32.mrb[5].mxu1 }
  0xec   :  { %1058 = vst [vmem:[#allocation2 + $0x18] sm:$0xff] %v1238_v5  ;;  %v596_v14 = vmax.f32 %v272_v6, 0.0  ;;  %v276_v15 = vadd.f32 %v275_v12, %v1482_v36  ;;  %v453_v16 = vadd.f32 %v452_v13, %v1486_v38  ;;  %v454_v17 = vpop.f32.mrb[6].mxu1 }
  0xed   :  { %v599_v18 = vmax.f32 %v274_v10, 0.0  ;;  %v597_v19 = vmax.f32 %v451_v11, 0.0  ;;  %v455_v20 = vadd.f32 %v454_v17, %v1484_v37  ;;  %v456_v21 = vpop.f32.mrb[7].mxu1 }
  0xee   :  { %v1239_v22 = vpack.c.bf16 %v596_v14, %v595_v9  ;;  %v600_v23 = vmax.f32 %v276_v15, 0.0  ;;  %v598_v24 = vmax.f32 %v453_v16, 0.0  ;;  %v457_v25 = vadd.f32 %v456_v21, %v1486_v38 }
  0xef   :  { %v601_v26 = vmax.f32 %v455_v20, 0.0 }
  0xf0   :  { %1059 = vst [vmem:[#allocation2 + $0x20] sm:$0xff] %v1239_v22  ;;  %v1241_v27 = vpack.c.bf16 %v600_v23, %v599_v18  ;;  %v1240_v28 = vpack.c.bf16 %v598_v24, %v597_v19  ;;  %v602_v29 = vmax.f32 %v457_v25, 0.0  ;;  %v279_v30 = vpop.f32.mrb[8].mxu0 }
  0xf1   :  { %v280_v31 = vadd.f32 %v279_v30, %v1480_v35  ;;  %v281_v32 = vpop.f32.mrb[9].mxu0 }
  0xf2   :  { %1061 = vst [vmem:[#allocation2 + $0x30] sm:$0xff] %v1241_v27  ;;  %1060 = vst [vmem:[#allocation2 + $0x28] sm:$0xff] %v1240_v28  ;;  %v1242_v33 = vpack.c.bf16 %v602_v29, %v601_v26  ;;  %v282_v34 = vadd.f32 %v281_v32, %v1482_v36  ;;  %v283_v39 = vpop.f32.mrb[10].mxu0  ;;  %v460_v40 = vpop.f32.mrb[8].mxu1 }
  0xf3   :  { %v603_v41 = vmax.f32 %v280_v31, 0.0  ;;  %v284_v42 = vadd.f32 %v283_v39, %v1480_v35  ;;  %v461_v43 = vadd.f32 %v460_v40, %v1484_v37  ;;  %v285_v44 = vpop.f32.mrb[11].mxu0  ;;  %v462_v45 = vpop.f32.mrb[9].mxu1 }
  0xf4   :  { %1062 = vst [vmem:[#allocation2 + $0x38] sm:$0xff] %v1242_v33  ;;  %v604_v46 = vmax.f32 %v282_v34, 0.0  ;;  %v286_v47 = vadd.f32 %v285_v44, %v1482_v36  ;;  %v463_v48 = vadd.f32 %v462_v45, %v1486_v38  ;;  %v464_v49 = vpop.f32.mrb[10].mxu1 }
  0xf5   :  { %v607_v50 = vmax.f32 %v284_v42, 0.0  ;;  %v605_v51 = vmax.f32 %v461_v43, 0.0  ;;  %v465_v52 = vadd.f32 %v464_v49, %v1484_v37  ;;  %v466_v53 = vpop.f32.mrb[11].mxu1 }
  0xf6   :  { %v1243_v54 = vpack.c.bf16 %v604_v46, %v603_v41  ;;  %v608_v55 = vmax.f32 %v286_v47, 0.0  ;;  %v606_v56 = vmax.f32 %v463_v48, 0.0  ;;  %v467_v57 = vadd.f32 %v466_v53, %v1486_v38 }
  0xf7   :  { %v609_v58 = vmax.f32 %v465_v52, 0.0 }
  0xf8   :  { %1063 = vst [vmem:[#allocation2 + $0x40] sm:$0xff] %v1243_v54  ;;  %v1245_v59 = vpack.c.bf16 %v608_v55, %v607_v50  ;;  %v1244_v60 = vpack.c.bf16 %v606_v56, %v605_v51  ;;  %v610_v61 = vmax.f32 %v467_v57, 0.0  ;;  %v289_v62 = vpop.f32.mrb[12].mxu0 }
  0xf9   :  { %v290_v63 = vadd.f32 %v289_v62, %v1480_v35  ;;  %v291_v0 = vpop.f32.mrb[13].mxu0 }
  0xfa   :  { %1065 = vst [vmem:[#allocation2 + $0x50] sm:$0xff] %v1245_v59  ;;  %1064 = vst [vmem:[#allocation2 + $0x48] sm:$0xff] %v1244_v60  ;;  %v1246_v1 = vpack.c.bf16 %v610_v61, %v609_v58  ;;  %v292_v2 = vadd.f32 %v291_v0, %v1482_v36  ;;  %v293_v3 = vpop.f32.mrb[14].mxu0  ;;  %v470_v4 = vpop.f32.mrb[12].mxu1 }
  0xfb   :  { %v611_v5 = vmax.f32 %v290_v63, 0.0  ;;  %v294_v6 = vadd.f32 %v293_v3, %v1480_v35  ;;  %v471_v7 = vadd.f32 %v470_v4, %v1484_v37  ;;  %v295_v8 = vpop.f32.mrb[15].mxu0  ;;  %v472_v9 = vpop.f32.mrb[13].mxu1 }
  0xfc   :  { %1066 = vst [vmem:[#allocation2 + $0x58] sm:$0xff] %v1246_v1  ;;  %v612_v10 = vmax.f32 %v292_v2, 0.0  ;;  %v296_v11 = vadd.f32 %v295_v8, %v1482_v36  ;;  %v473_v12 = vadd.f32 %v472_v9, %v1486_v38  ;;  %v474_v13 = vpop.f32.mrb[14].mxu1 }
  0xfd   :  { %v615_v14 = vmax.f32 %v294_v6, 0.0  ;;  %v613_v15 = vmax.f32 %v471_v7, 0.0  ;;  %v475_v16 = vadd.f32 %v474_v13, %v1484_v37  ;;  %v476_v17 = vpop.f32.mrb[15].mxu1 }
  0xfe   :  { %v1247_v18 = vpack.c.bf16 %v612_v10, %v611_v5  ;;  %v616_v19 = vmax.f32 %v296_v11, 0.0  ;;  %v614_v20 = vmax.f32 %v473_v12, 0.0  ;;  %v477_v21 = vadd.f32 %v476_v17, %v1486_v38 }
  0xff   :  { %v617_v22 = vmax.f32 %v475_v16, 0.0 }
 0x100   :  { %1067 = vst [vmem:[#allocation2 + $0x60] sm:$0xff] %v1247_v18  ;;  %v1249_v23 = vpack.c.bf16 %v616_v19, %v615_v14  ;;  %v1248_v24 = vpack.c.bf16 %v614_v20, %v613_v15  ;;  %v618_v25 = vmax.f32 %v477_v21, 0.0  ;;  %v299_v26 = vpop.f32.mrb[16].mxu0 }
 0x101   :  { %v300_v27 = vadd.f32 %v299_v26, %v1480_v35  ;;  %v301_v28 = vpop.f32.mrb[17].mxu0 }
 0x102   :  { %1069 = vst [vmem:[#allocation2 + $0x70] sm:$0xff] %v1249_v23  ;;  %1068 = vst [vmem:[#allocation2 + $0x68] sm:$0xff] %v1248_v24  ;;  %v1250_v29 = vpack.c.bf16 %v618_v25, %v617_v22  ;;  %v302_v30 = vadd.f32 %v301_v28, %v1482_v36  ;;  %v303_v31 = vpop.f32.mrb[18].mxu0  ;;  %v480_v32 = vpop.f32.mrb[16].mxu1 }
 0x103   :  { %v619_v33 = vmax.f32 %v300_v27, 0.0  ;;  %v304_v34 = vadd.f32 %v303_v31, %v1480_v35  ;;  %v481_v39 = vadd.f32 %v480_v32, %v1484_v37  ;;  %v305_v40 = vpop.f32.mrb[19].mxu0  ;;  %v482_v41 = vpop.f32.mrb[17].mxu1 }
 0x104   :  { %1070 = vst [vmem:[#allocation2 + $0x78] sm:$0xff] %v1250_v29  ;;  %v620_v42 = vmax.f32 %v302_v30, 0.0  ;;  %v306_v43 = vadd.f32 %v305_v40, %v1482_v36  ;;  %v483_v44 = vadd.f32 %v482_v41, %v1486_v38  ;;  %v484_v45 = vpop.f32.mrb[18].mxu1 }
 0x105   :  { %v623_v46 = vmax.f32 %v304_v34, 0.0  ;;  %v621_v47 = vmax.f32 %v481_v39, 0.0  ;;  %v485_v48 = vadd.f32 %v484_v45, %v1484_v37  ;;  %v486_v49 = vpop.f32.mrb[19].mxu1 }
 0x106   :  { %v1251_v50 = vpack.c.bf16 %v620_v42, %v619_v33  ;;  %v624_v51 = vmax.f32 %v306_v43, 0.0  ;;  %v622_v52 = vmax.f32 %v483_v44, 0.0  ;;  %v487_v53 = vadd.f32 %v486_v49, %v1486_v38 }
 0x107   :  { %v625_v54 = vmax.f32 %v485_v48, 0.0 }
 0x108   :  { %1071 = vst [vmem:[#allocation2 + $0x80] sm:$0xff] %v1251_v50  ;;  %v1253_v55 = vpack.c.bf16 %v624_v51, %v623_v46  ;;  %v1252_v56 = vpack.c.bf16 %v622_v52, %v621_v47  ;;  %v626_v57 = vmax.f32 %v487_v53, 0.0  ;;  %v309_v58 = vpop.f32.mrb[20].mxu0 }
 0x109   :  { %v310_v59 = vadd.f32 %v309_v58, %v1480_v35  ;;  %v311_v60 = vpop.f32.mrb[21].mxu0 }
 0x10a   :  { %1073 = vst [vmem:[#allocation2 + $0x90] sm:$0xff] %v1253_v55  ;;  %1072 = vst [vmem:[#allocation2 + $0x88] sm:$0xff] %v1252_v56  ;;  %v1254_v61 = vpack.c.bf16 %v626_v57, %v625_v54  ;;  %v312_v62 = vadd.f32 %v311_v60, %v1482_v36  ;;  %v313_v63 = vpop.f32.mrb[22].mxu0  ;;  %v490_v0 = vpop.f32.mrb[20].mxu1 }
 0x10b   :  { %v627_v1 = vmax.f32 %v310_v59, 0.0  ;;  %v314_v2 = vadd.f32 %v313_v63, %v1480_v35  ;;  %v491_v3 = vadd.f32 %v490_v0, %v1484_v37  ;;  %v315_v4 = vpop.f32.mrb[23].mxu0  ;;  %v492_v5 = vpop.f32.mrb[21].mxu1 }
 0x10c   :  { %1074 = vst [vmem:[#allocation2 + $0x98] sm:$0xff] %v1254_v61  ;;  %v628_v6 = vmax.f32 %v312_v62, 0.0  ;;  %v316_v7 = vadd.f32 %v315_v4, %v1482_v36  ;;  %v493_v8 = vadd.f32 %v492_v5, %v1486_v38  ;;  %v494_v9 = vpop.f32.mrb[22].mxu1 }
 0x10d   :  { %v631_v10 = vmax.f32 %v314_v2, 0.0  ;;  %v629_v11 = vmax.f32 %v491_v3, 0.0  ;;  %v495_v12 = vadd.f32 %v494_v9, %v1484_v37  ;;  %v496_v13 = vpop.f32.mrb[23].mxu1 }
 0x10e   :  { %v1255_v14 = vpack.c.bf16 %v628_v6, %v627_v1  ;;  %v632_v15 = vmax.f32 %v316_v7, 0.0  ;;  %v630_v16 = vmax.f32 %v493_v8, 0.0  ;;  %v497_v17 = vadd.f32 %v496_v13, %v1486_v38 }
 0x10f   :  { %v633_v18 = vmax.f32 %v495_v12, 0.0 }
 0x110   :  { %1075 = vst [vmem:[#allocation2 + $0xa0] sm:$0xff] %v1255_v14  ;;  %v1257_v19 = vpack.c.bf16 %v632_v15, %v631_v10  ;;  %v1256_v20 = vpack.c.bf16 %v630_v16, %v629_v11  ;;  %v634_v21 = vmax.f32 %v497_v17, 0.0  ;;  %v319_v22 = vpop.f32.mrb[24].mxu0 }
 0x111   :  { %v320_v23 = vadd.f32 %v319_v22, %v1480_v35  ;;  %v321_v24 = vpop.f32.mrb[25].mxu0 }
 0x112   :  { %1077 = vst [vmem:[#allocation2 + $0xb0] sm:$0xff] %v1257_v19  ;;  %1076 = vst [vmem:[#allocation2 + $0xa8] sm:$0xff] %v1256_v20  ;;  %v1258_v25 = vpack.c.bf16 %v634_v21, %v633_v18  ;;  %v322_v26 = vadd.f32 %v321_v24, %v1482_v36  ;;  %v323_v27 = vpop.f32.mrb[26].mxu0  ;;  %v500_v28 = vpop.f32.mrb[24].mxu1 }
 0x113   :  { %v635_v29 = vmax.f32 %v320_v23, 0.0  ;;  %v324_v30 = vadd.f32 %v323_v27, %v1480_v35  ;;  %v501_v31 = vadd.f32 %v500_v28, %v1484_v37  ;;  %v325_v32 = vpop.f32.mrb[27].mxu0  ;;  %v502_v33 = vpop.f32.mrb[25].mxu1 }
 0x114   :  { %1078 = vst [vmem:[#allocation2 + $0xb8] sm:$0xff] %v1258_v25  ;;  %v636_v34 = vmax.f32 %v322_v26, 0.0  ;;  %v326_v39 = vadd.f32 %v325_v32, %v1482_v36  ;;  %v503_v40 = vadd.f32 %v502_v33, %v1486_v38  ;;  %v504_v41 = vpop.f32.mrb[26].mxu1 }
 0x115   :  { %v639_v42 = vmax.f32 %v324_v30, 0.0  ;;  %v637_v43 = vmax.f32 %v501_v31, 0.0  ;;  %v505_v44 = vadd.f32 %v504_v41, %v1484_v37  ;;  %v506_v45 = vpop.f32.mrb[27].mxu1 }
 0x116   :  { %v1259_v46 = vpack.c.bf16 %v636_v34, %v635_v29  ;;  %v640_v47 = vmax.f32 %v326_v39, 0.0  ;;  %v638_v48 = vmax.f32 %v503_v40, 0.0  ;;  %v507_v49 = vadd.f32 %v506_v45, %v1486_v38 }
 0x117   :  { %v641_v50 = vmax.f32 %v505_v44, 0.0 }
 0x118   :  { %1079 = vst [vmem:[#allocation2 + $0xc0] sm:$0xff] %v1259_v46  ;;  %v1261_v51 = vpack.c.bf16 %v640_v47, %v639_v42  ;;  %v1260_v52 = vpack.c.bf16 %v638_v48, %v637_v43  ;;  %v642_v53 = vmax.f32 %v507_v49, 0.0  ;;  %v329_v54 = vpop.f32.mrb[28].mxu0 }
 0x119   :  { %v330_v55 = vadd.f32 %v329_v54, %v1480_v35  ;;  %v331_v56 = vpop.f32.mrb[29].mxu0 }
 0x11a   :  { %1081 = vst [vmem:[#allocation2 + $0xd0] sm:$0xff] %v1261_v51  ;;  %1080 = vst [vmem:[#allocation2 + $0xc8] sm:$0xff] %v1260_v52  ;;  %v1262_v57 = vpack.c.bf16 %v642_v53, %v641_v50  ;;  %v332_v58 = vadd.f32 %v331_v56, %v1482_v36  ;;  %v333_v59 = vpop.f32.mrb[30].mxu0  ;;  %v510_v60 = vpop.f32.mrb[28].mxu1 }
 0x11b   :  { %v643_v61 = vmax.f32 %v330_v55, 0.0  ;;  %v334_v62 = vadd.f32 %v333_v59, %v1480_v35  ;;  %v511_v63 = vadd.f32 %v510_v60, %v1484_v37  ;;  %v335_v0 = vpop.f32.mrb[31].mxu0  ;;  %v512_v1 = vpop.f32.mrb[29].mxu1 }
 0x11c   :  { %1082 = vst [vmem:[#allocation2 + $0xd8] sm:$0xff] %v1262_v57  ;;  %v644_v2 = vmax.f32 %v332_v58, 0.0  ;;  %v336_v3 = vadd.f32 %v335_v0, %v1482_v36  ;;  %v513_v4 = vadd.f32 %v512_v1, %v1486_v38  ;;  %v514_v5 = vpop.f32.mrb[30].mxu1 }
 0x11d   :  { %v647_v6 = vmax.f32 %v334_v62, 0.0  ;;  %v645_v7 = vmax.f32 %v511_v63, 0.0  ;;  %v515_v8 = vadd.f32 %v514_v5, %v1484_v37  ;;  %v516_v9 = vpop.f32.mrb[31].mxu1 }
 0x11e   :  { %v1263_v10 = vpack.c.bf16 %v644_v2, %v643_v61  ;;  %v648_v11 = vmax.f32 %v336_v3, 0.0  ;;  %v646_v12 = vmax.f32 %v513_v4, 0.0  ;;  %v517_v13 = vadd.f32 %v516_v9, %v1486_v38 }
 0x11f   :  { %v649_v14 = vmax.f32 %v515_v8, 0.0 }
 0x120   :  { %1083 = vst [vmem:[#allocation2 + $0xe0] sm:$0xff] %v1263_v10  ;;  %v1265_v15 = vpack.c.bf16 %v648_v11, %v647_v6  ;;  %v1264_v16 = vpack.c.bf16 %v646_v12, %v645_v7  ;;  %v650_v17 = vmax.f32 %v517_v13, 0.0  ;;  %v339_v18 = vpop.f32.mrb[32].mxu0 }
 0x121   :  { %v340_v19 = vadd.f32 %v339_v18, %v1480_v35  ;;  %v341_v20 = vpop.f32.mrb[33].mxu0 }
 0x122   :  { %1085 = vst [vmem:[#allocation2 + $0xf0] sm:$0xff] %v1265_v15  ;;  %1084 = vst [vmem:[#allocation2 + $0xe8] sm:$0xff] %v1264_v16  ;;  %v1266_v21 = vpack.c.bf16 %v650_v17, %v649_v14  ;;  %v342_v22 = vadd.f32 %v341_v20, %v1482_v36  ;;  %v343_v23 = vpop.f32.mrb[34].mxu0  ;;  %v520_v24 = vpop.f32.mrb[32].mxu1 }
 0x123   :  { %v651_v25 = vmax.f32 %v340_v19, 0.0  ;;  %v344_v26 = vadd.f32 %v343_v23, %v1480_v35  ;;  %v521_v27 = vadd.f32 %v520_v24, %v1484_v37  ;;  %v345_v28 = vpop.f32.mrb[35].mxu0  ;;  %v522_v29 = vpop.f32.mrb[33].mxu1 }
 0x124   :  { %1086 = vst [vmem:[#allocation2 + $0xf8] sm:$0xff] %v1266_v21  ;;  %v652_v30 = vmax.f32 %v342_v22, 0.0  ;;  %v346_v31 = vadd.f32 %v345_v28, %v1482_v36  ;;  %v523_v32 = vadd.f32 %v522_v29, %v1486_v38  ;;  %v524_v33 = vpop.f32.mrb[34].mxu1 }
 0x125   :  { %v655_v34 = vmax.f32 %v344_v26, 0.0  ;;  %v653_v39 = vmax.f32 %v521_v27, 0.0  ;;  %v525_v40 = vadd.f32 %v524_v33, %v1484_v37  ;;  %v526_v41 = vpop.f32.mrb[35].mxu1 }
 0x126   :  { %v1267_v42 = vpack.c.bf16 %v652_v30, %v651_v25  ;;  %v656_v43 = vmax.f32 %v346_v31, 0.0  ;;  %v654_v44 = vmax.f32 %v523_v32, 0.0  ;;  %v527_v45 = vadd.f32 %v526_v41, %v1486_v38 }
 0x127   :  { %v657_v46 = vmax.f32 %v525_v40, 0.0 }
 0x128   :  { %1087 = vst [vmem:[#allocation2 + $0x100] sm:$0xff] %v1267_v42  ;;  %v1269_v47 = vpack.c.bf16 %v656_v43, %v655_v34  ;;  %v1268_v48 = vpack.c.bf16 %v654_v44, %v653_v39  ;;  %v658_v49 = vmax.f32 %v527_v45, 0.0  ;;  %v349_v50 = vpop.f32.mrb[36].mxu0 }
 0x129   :  { %v350_v51 = vadd.f32 %v349_v50, %v1480_v35  ;;  %v351_v52 = vpop.f32.mrb[37].mxu0 }
 0x12a   :  { %1089 = vst [vmem:[#allocation2 + $0x110] sm:$0xff] %v1269_v47  ;;  %1088 = vst [vmem:[#allocation2 + $0x108] sm:$0xff] %v1268_v48  ;;  %v1270_v53 = vpack.c.bf16 %v658_v49, %v657_v46  ;;  %v352_v54 = vadd.f32 %v351_v52, %v1482_v36  ;;  %v353_v55 = vpop.f32.mrb[38].mxu0  ;;  %v530_v56 = vpop.f32.mrb[36].mxu1 }
 0x12b   :  { %v659_v57 = vmax.f32 %v350_v51, 0.0  ;;  %v354_v58 = vadd.f32 %v353_v55, %v1480_v35  ;;  %v531_v59 = vadd.f32 %v530_v56, %v1484_v37  ;;  %v355_v60 = vpop.f32.mrb[39].mxu0  ;;  %v532_v61 = vpop.f32.mrb[37].mxu1 }
 0x12c   :  { %1090 = vst [vmem:[#allocation2 + $0x118] sm:$0xff] %v1270_v53  ;;  %v660_v62 = vmax.f32 %v352_v54, 0.0  ;;  %v356_v63 = vadd.f32 %v355_v60, %v1482_v36  ;;  %v533_v0 = vadd.f32 %v532_v61, %v1486_v38  ;;  %v534_v1 = vpop.f32.mrb[38].mxu1 }
 0x12d   :  { %v663_v2 = vmax.f32 %v354_v58, 0.0  ;;  %v661_v3 = vmax.f32 %v531_v59, 0.0  ;;  %v535_v4 = vadd.f32 %v534_v1, %v1484_v37  ;;  %v536_v5 = vpop.f32.mrb[39].mxu1 }
 0x12e   :  { %v1271_v6 = vpack.c.bf16 %v660_v62, %v659_v57  ;;  %v664_v7 = vmax.f32 %v356_v63, 0.0  ;;  %v662_v8 = vmax.f32 %v533_v0, 0.0  ;;  %v537_v9 = vadd.f32 %v536_v5, %v1486_v38 }
 0x12f   :  { %v665_v10 = vmax.f32 %v535_v4, 0.0 }
 0x130   :  { %1091 = vst [vmem:[#allocation2 + $0x120] sm:$0xff] %v1271_v6  ;;  %v1273_v11 = vpack.c.bf16 %v664_v7, %v663_v2  ;;  %v1272_v12 = vpack.c.bf16 %v662_v8, %v661_v3  ;;  %v666_v13 = vmax.f32 %v537_v9, 0.0  ;;  %v359_v14 = vpop.f32.mrb[40].mxu0 }
 0x131   :  { %v360_v15 = vadd.f32 %v359_v14, %v1480_v35  ;;  %v361_v16 = vpop.f32.mrb[41].mxu0 }
 0x132   :  { %1093 = vst [vmem:[#allocation2 + $0x130] sm:$0xff] %v1273_v11  ;;  %1092 = vst [vmem:[#allocation2 + $0x128] sm:$0xff] %v1272_v12  ;;  %v1274_v17 = vpack.c.bf16 %v666_v13, %v665_v10  ;;  %v362_v18 = vadd.f32 %v361_v16, %v1482_v36  ;;  %v363_v19 = vpop.f32.mrb[42].mxu0  ;;  %v540_v20 = vpop.f32.mrb[40].mxu1 }
 0x133   :  { %v667_v21 = vmax.f32 %v360_v15, 0.0  ;;  %v364_v22 = vadd.f32 %v363_v19, %v1480_v35  ;;  %v541_v23 = vadd.f32 %v540_v20, %v1484_v37  ;;  %v365_v24 = vpop.f32.mrb[43].mxu0  ;;  %v542_v25 = vpop.f32.mrb[41].mxu1 }
 0x134   :  { %1094 = vst [vmem:[#allocation2 + $0x138] sm:$0xff] %v1274_v17  ;;  %v668_v26 = vmax.f32 %v362_v18, 0.0  ;;  %v366_v27 = vadd.f32 %v365_v24, %v1482_v36  ;;  %v543_v28 = vadd.f32 %v542_v25, %v1486_v38  ;;  %v544_v29 = vpop.f32.mrb[42].mxu1 }
 0x135   :  { %v671_v30 = vmax.f32 %v364_v22, 0.0  ;;  %v669_v31 = vmax.f32 %v541_v23, 0.0  ;;  %v545_v32 = vadd.f32 %v544_v29, %v1484_v37  ;;  %v546_v33 = vpop.f32.mrb[43].mxu1 }
 0x136   :  { %v1275_v34 = vpack.c.bf16 %v668_v26, %v667_v21  ;;  %v672_v39 = vmax.f32 %v366_v27, 0.0  ;;  %v670_v40 = vmax.f32 %v543_v28, 0.0  ;;  %v547_v41 = vadd.f32 %v546_v33, %v1486_v38 }
 0x137   :  { %v673_v42 = vmax.f32 %v545_v32, 0.0 }
 0x138   :  { %1095 = vst [vmem:[#allocation2 + $0x140] sm:$0xff] %v1275_v34  ;;  %v1277_v43 = vpack.c.bf16 %v672_v39, %v671_v30  ;;  %v1276_v44 = vpack.c.bf16 %v670_v40, %v669_v31  ;;  %v674_v45 = vmax.f32 %v547_v41, 0.0  ;;  %v369_v46 = vpop.f32.mrb[44].mxu0 }
 0x139   :  { %v370_v47 = vadd.f32 %v369_v46, %v1480_v35  ;;  %v371_v48 = vpop.f32.mrb[45].mxu0 }
 0x13a   :  { %1097 = vst [vmem:[#allocation2 + $0x150] sm:$0xff] %v1277_v43  ;;  %1096 = vst [vmem:[#allocation2 + $0x148] sm:$0xff] %v1276_v44  ;;  %v1278_v49 = vpack.c.bf16 %v674_v45, %v673_v42  ;;  %v372_v50 = vadd.f32 %v371_v48, %v1482_v36  ;;  %v373_v51 = vpop.f32.mrb[46].mxu0  ;;  %v550_v52 = vpop.f32.mrb[44].mxu1 }
 0x13b   :  { %v675_v53 = vmax.f32 %v370_v47, 0.0  ;;  %v374_v54 = vadd.f32 %v373_v51, %v1480_v35  ;;  %v551_v55 = vadd.f32 %v550_v52, %v1484_v37  ;;  %v375_v56 = vpop.f32.mrb[47].mxu0  ;;  %v552_v57 = vpop.f32.mrb[45].mxu1 }
 0x13c   :  { %1098 = vst [vmem:[#allocation2 + $0x158] sm:$0xff] %v1278_v49  ;;  %v676_v58 = vmax.f32 %v372_v50, 0.0  ;;  %v376_v59 = vadd.f32 %v375_v56, %v1482_v36  ;;  %v553_v60 = vadd.f32 %v552_v57, %v1486_v38  ;;  %v554_v61 = vpop.f32.mrb[46].mxu1 }
 0x13d   :  { %v679_v62 = vmax.f32 %v374_v54, 0.0  ;;  %v677_v63 = vmax.f32 %v551_v55, 0.0  ;;  %v555_v0 = vadd.f32 %v554_v61, %v1484_v37  ;;  %v556_v1 = vpop.f32.mrb[47].mxu1 }
 0x13e   :  { %v1279_v2 = vpack.c.bf16 %v676_v58, %v675_v53  ;;  %v680_v3 = vmax.f32 %v376_v59, 0.0  ;;  %v678_v4 = vmax.f32 %v553_v60, 0.0  ;;  %v557_v5 = vadd.f32 %v556_v1, %v1486_v38 }
 0x13f   :  { %v681_v6 = vmax.f32 %v555_v0, 0.0 }
 0x140   :  { %1099 = vst [vmem:[#allocation2 + $0x160] sm:$0xff] %v1279_v2  ;;  %v1281_v7 = vpack.c.bf16 %v680_v3, %v679_v62  ;;  %v1280_v8 = vpack.c.bf16 %v678_v4, %v677_v63  ;;  %v682_v9 = vmax.f32 %v557_v5, 0.0  ;;  %v379_v10 = vpop.f32.mrb[48].mxu0 }
 0x141   :  { %v380_v11 = vadd.f32 %v379_v10, %v1480_v35  ;;  %v381_v12 = vpop.f32.mrb[49].mxu0 }
 0x142   :  { %1101 = vst [vmem:[#allocation2 + $0x170] sm:$0xff] %v1281_v7  ;;  %1100 = vst [vmem:[#allocation2 + $0x168] sm:$0xff] %v1280_v8  ;;  %v1282_v13 = vpack.c.bf16 %v682_v9, %v681_v6  ;;  %v382_v14 = vadd.f32 %v381_v12, %v1482_v36  ;;  %v383_v15 = vpop.f32.mrb[50].mxu0  ;;  %v560_v16 = vpop.f32.mrb[48].mxu1 }
 0x143   :  { %v683_v17 = vmax.f32 %v380_v11, 0.0  ;;  %v384_v18 = vadd.f32 %v383_v15, %v1480_v35  ;;  %v561_v19 = vadd.f32 %v560_v16, %v1484_v37  ;;  %v385_v20 = vpop.f32.mrb[51].mxu0  ;;  %v562_v21 = vpop.f32.mrb[49].mxu1 }
 0x144   :  { %1102 = vst [vmem:[#allocation2 + $0x178] sm:$0xff] %v1282_v13  ;;  %v684_v22 = vmax.f32 %v382_v14, 0.0  ;;  %v386_v23 = vadd.f32 %v385_v20, %v1482_v36  ;;  %v563_v24 = vadd.f32 %v562_v21, %v1486_v38  ;;  %v564_v25 = vpop.f32.mrb[50].mxu1 }
 0x145   :  { %v687_v26 = vmax.f32 %v384_v18, 0.0  ;;  %v685_v27 = vmax.f32 %v561_v19, 0.0  ;;  %v565_v28 = vadd.f32 %v564_v25, %v1484_v37  ;;  %v566_v29 = vpop.f32.mrb[51].mxu1 }
 0x146   :  { %v1283_v30 = vpack.c.bf16 %v684_v22, %v683_v17  ;;  %v688_v31 = vmax.f32 %v386_v23, 0.0  ;;  %v686_v32 = vmax.f32 %v563_v24, 0.0  ;;  %v567_v33 = vadd.f32 %v566_v29, %v1486_v38 }
 0x147   :  { %v689_v34 = vmax.f32 %v565_v28, 0.0 }
 0x148   :  { %1103 = vst [vmem:[#allocation2 + $0x180] sm:$0xff] %v1283_v30  ;;  %v1285_v39 = vpack.c.bf16 %v688_v31, %v687_v26  ;;  %v1284_v40 = vpack.c.bf16 %v686_v32, %v685_v27  ;;  %v690_v41 = vmax.f32 %v567_v33, 0.0  ;;  %v389_v42 = vpop.f32.mrb[52].mxu0 }
 0x149   :  { %v390_v43 = vadd.f32 %v389_v42, %v1480_v35  ;;  %v391_v44 = vpop.f32.mrb[53].mxu0 }
 0x14a   :  { %1105 = vst [vmem:[#allocation2 + $0x190] sm:$0xff] %v1285_v39  ;;  %1104 = vst [vmem:[#allocation2 + $0x188] sm:$0xff] %v1284_v40  ;;  %v1286_v45 = vpack.c.bf16 %v690_v41, %v689_v34  ;;  %v392_v46 = vadd.f32 %v391_v44, %v1482_v36  ;;  %v393_v47 = vpop.f32.mrb[54].mxu0  ;;  %v570_v48 = vpop.f32.mrb[52].mxu1 }
 0x14b   :  { %v691_v49 = vmax.f32 %v390_v43, 0.0  ;;  %v394_v50 = vadd.f32 %v393_v47, %v1480_v35  ;;  %v571_v51 = vadd.f32 %v570_v48, %v1484_v37  ;;  %v395_v52 = vpop.f32.mrb[55].mxu0  ;;  %v572_v53 = vpop.f32.mrb[53].mxu1 }
 0x14c   :  { %1106 = vst [vmem:[#allocation2 + $0x198] sm:$0xff] %v1286_v45  ;;  %v692_v54 = vmax.f32 %v392_v46, 0.0  ;;  %v396_v55 = vadd.f32 %v395_v52, %v1482_v36  ;;  %v573_v56 = vadd.f32 %v572_v53, %v1486_v38  ;;  %v574_v57 = vpop.f32.mrb[54].mxu1 }
 0x14d   :  { %v695_v58 = vmax.f32 %v394_v50, 0.0  ;;  %v693_v59 = vmax.f32 %v571_v51, 0.0  ;;  %v575_v60 = vadd.f32 %v574_v57, %v1484_v37  ;;  %v576_v61 = vpop.f32.mrb[55].mxu1 }
 0x14e   :  { %v1287_v62 = vpack.c.bf16 %v692_v54, %v691_v49  ;;  %v696_v63 = vmax.f32 %v396_v55, 0.0  ;;  %v694_v0 = vmax.f32 %v573_v56, 0.0  ;;  %v577_v1 = vadd.f32 %v576_v61, %v1486_v38 }
 0x14f   :  { %v697_v2 = vmax.f32 %v575_v60, 0.0 }
 0x150   :  { %1107 = vst [vmem:[#allocation2 + $0x1a0] sm:$0xff] %v1287_v62  ;;  %v1289_v3 = vpack.c.bf16 %v696_v63, %v695_v58  ;;  %v1288_v4 = vpack.c.bf16 %v694_v0, %v693_v59  ;;  %v698_v5 = vmax.f32 %v577_v1, 0.0  ;;  %v399_v6 = vpop.f32.mrb[56].mxu0 }
 0x151   :  { %v400_v7 = vadd.f32 %v399_v6, %v1480_v35  ;;  %v401_v8 = vpop.f32.mrb[57].mxu0 }
 0x152   :  { %1109 = vst [vmem:[#allocation2 + $0x1b0] sm:$0xff] %v1289_v3  ;;  %1108 = vst [vmem:[#allocation2 + $0x1a8] sm:$0xff] %v1288_v4  ;;  %v1290_v9 = vpack.c.bf16 %v698_v5, %v697_v2  ;;  %v402_v10 = vadd.f32 %v401_v8, %v1482_v36  ;;  %v403_v11 = vpop.f32.mrb[58].mxu0  ;;  %v580_v12 = vpop.f32.mrb[56].mxu1 }
 0x153   :  { %v699_v13 = vmax.f32 %v400_v7, 0.0  ;;  %v581_v14 = vadd.f32 %v580_v12, %v1484_v37  ;;  %v404_v15 = vpop.f32.mrb[59].mxu0  ;;  %v582_v16 = vpop.f32.mrb[57].mxu1 }
 0x154   :  { %1110 = vst [vmem:[#allocation2 + $0x1b8] sm:$0xff] %v1290_v9  ;;  %v700_v17 = vmax.f32 %v402_v10, 0.0  ;;  %v583_v18 = vadd.f32 %v582_v16, %v1486_v38  ;;  %v584_v19 = vpop.f32.mrb[58].mxu1 }
 0x155   :  { %v701_v35 = vmax.f32 %v581_v14, 0.0  ;;  %v585_v20 = vpop.f32.mrb[59].mxu1 }
 0x156   :  { %v1291_v21 = vpack.c.bf16 %v700_v17, %v699_v13  ;;  %v702_v22 = vmax.f32 %v583_v18, 0.0 }
 0x158   :  { %1111 = vst [vmem:[#allocation2 + $0x1c0] sm:$0xff] %v1291_v21  ;;  %v1292_v36 = vpack.c.bf16 %v702_v22, %v701_v35 }
 0x15a   :  { %1112 = vst [vmem:[#allocation2 + $0x1c8] sm:$0xff] %v1292_v36 }
 0x15b   :  { %1324 = shalt.err (!%p1321_p4)
}
 0x15c   :  { %s1325_s20 = scalar_lea.hbm %s1619_s3, 7424 }
 0x15d   :  { %p1326_p5 = scmp.ne.s32.totalorder %s1619_s3, %s1325_s20  ;;  %p1329_p6 = scmp.lt.u32.totalorder %s1325_s20, %s1619_s3 }
 0x15f   :  { %p1331_p7 = pnand %p1329_p6, %p1326_p5 }
 0x161   :  { %1334 = shalt.err (!%p1331_p7)
}
 0x162   :  { %s1340_s25 = smov 256   ;;  %s1341_s26 = smov 16  }
 0x163   :  { %1124 = dma.vmem_to_hbm [thread:$0]  %s1119_s2, 7424, %s1619_s3, [#allocation3], %s1340_s25, %s1340_s25, %s1341_s26  }
 0x164   :  { %1335 = dma.done.wait [#allocation3], 7424  }
 0x165   :  { %1336 = vsyncadd [#allocation3], 4294959872 }
 0x166   :  { %1128 = vsyncpa [#allocation3], 1 }

</bundles_post_ra>
